<compile_context>
chip_gen: v7x
topology: tpu7x:2x2x1
jax: 0.10.0
libtpu: 0.0.40
codegen_flags: <defaults>
</compile_context>

<pallas_src>
import math

import jax
import jax.numpy as jnp
from jax.experimental import pallas as pl
from jax.experimental.pallas import tpu as pltpu


def swiglu_kernel(x_ref, w13_ref, w2_ref, o_ref):
    H = w2_ref.shape[0]
    x = x_ref[...]                                                     # (tm, dim)
    # Fused gate projection: one MXU matmul covers both w1 and w3.
    g = jnp.dot(x, w13_ref[...], preferred_element_type=jnp.float32)  # (tm, 2H)
    h1 = g[:, :H]                                                      # silu branch (lane-aligned slice)
    h3 = g[:, H:]                                                      # linear gate
    h = (h1 * jax.nn.sigmoid(h1)) * h3                                 # SwiGLU: VPU mul + EUP sigmoid
    out = jnp.dot(h, w2_ref[...], preferred_element_type=jnp.float32)  # (tm, dim)
    o_ref[...] = out.astype(o_ref.dtype)
    # TODO(synk): dropout is inference-mode identity; training-mode dropout
    # (pltpu.prng_seed / prng_random_bits masking) intentionally not implemented.


def _pick_block_m(M):
    """Row tile: dense vregs, and >=2 blocks when possible so v7x megacore is used."""
    if M >= 256 and M % 128 == 0:
        return 128
    if M % 8 == 0 and M >= 16:
        return max(8, ((M // 2) // 8) * 8)
    return M


def swiglu_ffn_forward(x, w1, w3, w2, *, block_m=None):
    """x: (..., dim); w1, w3: (dim, hidden); w2: (hidden, dim). Returns (..., dim)."""
    orig_shape = x.shape
    dim = orig_shape[-1]
    hidden = w1.shape[1]
    M = math.prod(orig_shape[:-1])

    x2 = x.reshape(M, dim)                      # flatten OUTSIDE the kernel
    w13 = jnp.concatenate([w1, w3], axis=1)     # (dim, 2*hidden) fused operand

    if block_m is None:
        block_m = _pick_block_m(M)
    grid = (pl.cdiv(M, block_m),)

    out = pl.pallas_call(
        swiglu_kernel,
        out_shape=jax.ShapeDtypeStruct((M, dim), x.dtype),
        grid=grid,
        in_specs=[
            pl.BlockSpec((block_m, dim), lambda i: (i, 0)),       # x row tile
            pl.BlockSpec((dim, 2 * hidden), lambda i: (0, 0)),    # fused w1|w3 (replicated)
            pl.BlockSpec((hidden, dim), lambda i: (0, 0)),        # w2 (replicated)
        ],
        out_specs=pl.BlockSpec((block_m, dim), lambda i: (i, 0)),
        compiler_params=pltpu.CompilerParams(
            dimension_semantics=("parallel",)),
    )(x2, w13, w2)
    return out.reshape(orig_shape)


def reference_forward(x, w1, w3, w2):
    """Pure-JAX reference mirroring the PyTorch module (dropout = identity)."""
    h = jax.nn.silu(x @ w1) * (x @ w3)
    return h @ w2


if __name__ == "__main__":
    # Small, lane-aligned shapes: batch=2, seq=8, dim=128, hidden=256.
    BATCH, SEQ, DIM, HIDDEN = 2, 8, 128, 256

    key = jax.random.PRNGKey(0)
    kx, k1, k3, k2 = jax.random.split(key, 4)

    x = jax.random.normal(kx, (BATCH, SEQ, DIM), jnp.float32)
    # PyTorch nn.Linear default init: U(-1/sqrt(fan_in), 1/sqrt(fan_in)); stored transposed.
    k_in = 1.0 / math.sqrt(DIM)
    k_hid = 1.0 / math.sqrt(HIDDEN)
    w1 = jax.random.uniform(k1, (DIM, HIDDEN), jnp.float32, -k_in, k_in)
    w3 = jax.random.uniform(k3, (DIM, HIDDEN), jnp.float32, -k_in, k_in)
    w2 = jax.random.uniform(k2, (HIDDEN, DIM), jnp.float32, -k_hid, k_hid)

    y = jax.block_until_ready(swiglu_ffn_forward(x, w1, w3, w2))
    y_ref = reference_forward(x, w1, w3, w2)

    assert y.shape == (BATCH, SEQ, DIM)
    assert jnp.allclose(y, y_ref, rtol=1e-2, atol=1e-2), float(jnp.max(jnp.abs(y - y_ref)))

    print("KERNEL_OK")
</pallas_src>

<mosaic_0001>
module attributes {stable_mosaic.version = 11 : i64} {
  func.func @swiglu_kernel(%arg0: i32, %arg1: memref<8x128xf32, #tpu.memory_space<vmem>>, %arg2: memref<128x512xf32, #tpu.memory_space<vmem>>, %arg3: memref<256x128xf32, #tpu.memory_space<vmem>>, %arg4: memref<8x128xf32, #tpu.memory_space<vmem>>) attributes {dimension_semantics = [#tpu.dimension_semantics<parallel>], iteration_bounds = array<i64: 2>, scalar_prefetch = 0 : i64, scratch_operands = 0 : i64, tpu.core_type = #tpu.core_type<tc>, window_params = [{transform_indices = @transform_0, window_bounds = array<i64: 8, 128>}, {pipeline_mode = #tpu.pipeline_mode<synchronous>, transform_indices = @transform_1, window_bounds = array<i64: 128, 512>}, {pipeline_mode = #tpu.pipeline_mode<synchronous>, transform_indices = @transform_2, window_bounds = array<i64: 256, 128>}, {transform_indices = @transform_3, window_bounds = array<i64: 8, 128>}]} {
    %c0 = arith.constant 0 : index
    %c0_0 = arith.constant 0 : index
    %0 = vector.load %arg1[%c0, %c0_0] : memref<8x128xf32, #tpu.memory_space<vmem>>, vector<8x128xf32>
    %c0_1 = arith.constant 0 : index
    %c0_2 = arith.constant 0 : index
    %1 = vector.load %arg2[%c0_1, %c0_2] : memref<128x512xf32, #tpu.memory_space<vmem>>, vector<128x512xf32>
    %cst = arith.constant dense<0.000000e+00> : vector<8x512xf32>
    %2 = tpu.matmul %0, %1, %cst {dimension_numbers = #tpu.dot_dimension_numbers<[1], [0], [0], [1], [0, 0, 1, 1], [], []>} : vector<8x128xf32>, vector<128x512xf32>, vector<8x512xf32> -> vector<8x512xf32>
    %3 = vector.extract_strided_slice %2 {offsets = [0, 0], sizes = [8, 256], strides = [1, 1]} : vector<8x512xf32> to vector<8x256xf32>
    %4 = vector.extract_strided_slice %2 {offsets = [0, 256], sizes = [8, 256], strides = [1, 1]} : vector<8x512xf32> to vector<8x256xf32>
    %5 = arith.negf %3 : vector<8x256xf32>
    %6 = math.exp %5 : vector<8x256xf32>
    %cst_3 = arith.constant 1.000000e+00 : f32
    %7 = vector.broadcast %cst_3 : f32 to vector<8x256xf32>
    %8 = arith.addf %7, %6 : vector<8x256xf32>
    %9 = arith.divf %7, %8 : vector<8x256xf32>
    %10 = arith.mulf %3, %9 : vector<8x256xf32>
    %11 = arith.mulf %10, %4 : vector<8x256xf32>
    %c0_4 = arith.constant 0 : index
    %c0_5 = arith.constant 0 : index
    %12 = vector.load %arg3[%c0_4, %c0_5] : memref<256x128xf32, #tpu.memory_space<vmem>>, vector<256x128xf32>
    %cst_6 = arith.constant dense<0.000000e+00> : vector<8x128xf32>
    %13 = tpu.matmul %11, %12, %cst_6 {dimension_numbers = #tpu.dot_dimension_numbers<[1], [0], [0], [1], [0, 0, 1, 1], [], []>} : vector<8x256xf32>, vector<256x128xf32>, vector<8x128xf32> -> vector<8x128xf32>
    %c0_7 = arith.constant 0 : index
    %c0_8 = arith.constant 0 : index
    %14 = vector.load %arg4[%c0_7, %c0_8] : memref<8x128xf32, #tpu.memory_space<vmem>>, vector<8x128xf32>
    tpu.vector_store %arg4[%c0_7, %c0_8], %13 {strides = array<i32>} : memref<8x128xf32, #tpu.memory_space<vmem>>, vector<8x128xf32>,
    return
  }
  func.func @transform_0(%arg0: i32) -> (i32, i32) {
    %c0_i32 = arith.constant 0 : i32
    %c0_i32_0 = arith.constant 0 : i32
    return %arg0, %c0_i32 : i32, i32
  }
  func.func @transform_1(%arg0: i32) -> (i32, i32) {
    %c0_i32 = arith.constant 0 : i32
    %c0_i32_0 = arith.constant 0 : i32
    %c0_i32_1 = arith.constant 0 : i32
    return %c0_i32, %c0_i32_0 : i32, i32
  }
  func.func @transform_2(%arg0: i32) -> (i32, i32) {
    %c0_i32 = arith.constant 0 : i32
    %c0_i32_0 = arith.constant 0 : i32
    %c0_i32_1 = arith.constant 0 : i32
    return %c0_i32, %c0_i32_0 : i32, i32
  }
  func.func @transform_3(%arg0: i32) -> (i32, i32) {
    %c0_i32 = arith.constant 0 : i32
    %c0_i32_0 = arith.constant 0 : i32
    return %arg0, %c0_i32 : i32, i32
  }
}

</mosaic_0001>

<bundles_post_ra>
// kernel: tpu_custom_call.1
= control target key start
LH: loop header
LB: loop body
LE: loop exit
PB: predicated region body
PF: predicated region fallthrough
CT: control target
= control target key end

     0   :  { %8 = vsyncpa [#allocation3], 0  ;;  %s1296_s0 = inlined_call_operand.hbm [shape: f32[16,128], index: 0, kind: input, shape index: {}]   ;;  %s1297_s1 = inlined_call_operand.hbm [shape: f32[128,512], index: 1, kind: input, shape index: {}]   ;;  %s1298_s2 = inlined_call_operand.hbm [shape: f32[256,128], index: 2, kind: input, shape index: {}]   ;;  %s1299_s3 = inlined_call_operand.hbm [shape: f32[16,128], index: 3, kind: output, shape index: {}]  }
   0x1   :  { %10 = vsyncpa [#allocation3 + $0x1], 0 }
   0x2   :  { %11 = vsyncpa [#allocation6], 0 }
   0x3   :  { %12 = vsyncpa [#allocation4], 0 }
   0x4   :  { %14 = vsyncpa [#allocation4 + $0x1], 0  ;;  %s1060_s12 = smov 0   ;;  %s1062_s13 = smov 0  }
   0x5   :  { %s1064_s14 = smov 0   ;;  %s1066_s15 = smov 0  }
   0x6 LB: > { %s1081_s16 = sadd.s32 4294967295, %s1029_s15   ;;  %s644_s17 = sadd.s32 4294967294, %s1029_s15   ;;  %s1029_s15 = sphi %s1066_s15, %s1319_s15   ;;  %s1025_s14 = sphi %s1064_s14, %s1318_s14   ;;  %s1021_s13 = sphi %s1062_s13, %s1317_s13   ;;  %s1017_s12 = sphi %s1060_s12, %s1316_s12  }
   0x7   : > { %p40_p0 = scmp.ne.s32.totalorder %s1021_s13, %s1017_s12  ;;  %p1300_p1 = scmp.eq.s32.totalorder %s1081_s16, 0 }
   0x8   : > { %p112_p3 = scmp.eq.s32.totalorder %s644_s17, 1  ;;  %p645_p5 = scmp.ge.s32.totalorder %s1029_s15, 1 }
   0x9   : > { %p1090_p4 = por %p1300_p1, %p40_p0  ;;  %p119_p7 = scmp.lt.s32.totalorder %s1029_s15, 3 }
   0xa   : > { %p1095_p6 = por %p112_p3, %p40_p0  ;;  %s1031_s21 = smov [#allocation5]  }
   0xb   : > { %s1303_s18 = scalar_select %p1090_p4, 1, 0 }
   0xc   : > { %s1304_s19 = scalar_select %p1095_p6, 1, 0 }
   0xd   : > { %p1100_p8 = pnand %p645_p5, %p119_p7  ;;  %s131_s22 = sshll.u32 %s1031_s21, 4  ;;  %s1104_s22 = int_to_ptr.vmem [resolvable:$true] %s131_s22 }
   0xe   : > { %s1032_s24 = smov [#allocation7]   ;;  %s873_s28 = scalar_lea.hbm %s1297_s1, 8192 }
   0xf   : > { %p805_p9 = pneg %p1100_p8  ;;  %s144_s25 = sshll.u32 %s1032_s24, 4  ;;  %s1115_s25 = int_to_ptr.vmem [resolvable:$true] %s144_s25 }
  0x10   : > { %p874_p12 = scmp.ne.s32.totalorder %s1297_s1, %s873_s28  ;;  %p880_p5 = scmp.lt.u32.totalorder %s873_s28, %s1297_s1 }
  0x11   : > { %p1111_p11 = pnand %p805_p9, %p1300_p1 }
  0x13   : > { %p875_p13 = pneg %p1111_p11 }
  0x15   : > { %p876_p0 = pnand %p875_p13, %p874_p12 }
  0x17   : > { %p877_p3 = pneg %p876_p0 }
  0x19   : > { %p882_p7 = pnand %p880_p5, %p877_p3 }
  0x1b   : > { %885 = shalt.err (!%p882_p7)
}
  0x1c   : > { %s886_s6 = scalar_lea.vmem %s1104_s22, 8192  ;;  %p894_p2 = scmp.lt.s32.totalorder %s1104_s22, %s1104_s22 }
  0x1d   : > { %p887_p9 = scmp.ne.s32.totalorder %s1104_s22, %s886_s6  ;;  %p895_p12 = scmp.lt.s32.totalorder %s886_s6, %s886_s6 }
  0x1f   : > { %p889_p10 = pnand %p887_p9, %p875_p13  ;;  %p896_p0 = por %p895_p12, %p894_p2 }
  0x21   : > { %p890_p1 = pneg %p889_p10 }
  0x23   : > { %p897_p6 = pnand %p896_p0, %p890_p1 }
  0x25   : > { %900 = shalt.err (!%p897_p6)
}
  0x26   : > { %s1033_s7 = smov 512   ;;  %s1034_s8 = smov 32  }
  0x27   : > { %808 = dma.hbm_to_vmem [thread:$0]  (!%p1111_p11), %s1297_s1, 8192, %s1104_s22, [#allocation6], %s1033_s7, %s1033_s7, %s1034_s8  }
  0x28   : > { %s901_s21 = scalar_lea.hbm %s1298_s2, 4096 }
  0x29   : > { %p902_p2 = scmp.ne.s32.totalorder %s1298_s2, %s901_s21  ;;  %p908_p10 = scmp.lt.u32.totalorder %s901_s21, %s1298_s2 }
  0x2b   : > { %p904_p1 = pnand %p902_p2, %p875_p13 }
  0x2d   : > { %p905_p6 = pneg %p904_p1 }
  0x2f   : > { %p910_p3 = pnand %p908_p10, %p905_p6 }
  0x31   : > { %913 = shalt.err (!%p910_p3)
}
  0x32   : > { %s914_s22 = scalar_lea.vmem %s1115_s25, 4096  ;;  %p922_p12 = scmp.lt.s32.totalorder %s1115_s25, %s1115_s25 }
  0x33   : > { %p915_p5 = scmp.ne.s32.totalorder %s1115_s25, %s914_s22  ;;  %p923_p0 = scmp.lt.s32.totalorder %s914_s22, %s914_s22 }
  0x35   : > { %p917_p7 = pnand %p915_p5, %p875_p13  ;;  %p924_p2 = por %p923_p0, %p922_p12 }
  0x37   : > { %p918_p9 = pneg %p917_p7 }
  0x39   : > { %p925_p1 = pnand %p924_p2, %p918_p9 }
  0x3b   : > { %928 = shalt.err (!%p925_p1)
}
  0x3c   : > { %s1035_s29 = smov 128   ;;  %s1036_s30 = smov 8  }
  0x3d   : > { %811 = dma.hbm_to_vmem [thread:$0]  (!%p1111_p11), %s1298_s2, 4096, %s1115_s25, [#allocation6], %s1035_s29, %s1035_s29, %s1036_s30  }
  0x3e   : > { %s1170_s6 = sadd.s32 1, %s1029_s15   ;;  %s27_s8 = sadd.s32 1, %s1025_s14 }
  0x3f   : > { %s24_s7 = ssub.s32 %s1029_s15, %s1170_s6  ;;  %p34_p6 = scmp.ne.s32.totalorder %s1025_s14, %s1021_s13 }
  0x40   : > { %p25_p13 = scmp.eq.s32.totalorder %s24_s7, 0  ;;  %p35_p10 = scmp.eq.s32.totalorder %s1029_s15, 0 }
  0x41   : > { %p1307_p5 = scmp.eq.s32.totalorder %s1081_s16, 1  ;;  %p822_p9 = scmp.lt.s32.totalorder %s1029_s15, 2 }
  0x42   : > { %s1179_s9 = scalar_select %p25_p13, %s1025_s14, %s27_s8  }
  0x43   : > { %p36_p3 = por %p35_p10, %p34_p6  ;;  %p1183_p7 = por %p1307_p5, %p34_p6 }
  0x44   : > { %s158_s23 = sand.u32 1, %s1025_s14   ;;  %s650_s25 = sshll.u32 %s1029_s15, 7 }
  0x45   : > { %s1308_s10 = scalar_select %p1183_p7, 1, 0 }
  0x46   : > { %s649_s11 = sshll.u32 %s158_s23, 3  ;;  %s1193_s24 = scalar_lea.hbm %s1296_s0, %s650_s25 }
  0x47   : > { %s162_s26 = scalar_lea.vmem [#allocation2], %s649_s11  ;;  %p1197_p11 = pnand %p822_p9, %p36_p3 }
  0x48   : > { %s169_s27 = sshll.u32 %s162_s26, 4  ;;  %s159_s22 = scalar_lea.sflag [#allocation3], %s158_s23  ;;  %s1195_s27 = int_to_ptr.vmem [resolvable:$true] %s169_s27 }
  0x49   : > { %s929_s29 = scalar_lea.hbm %s1193_s24, 128  ;;  %p931_p0 = pneg %p1197_p11 }
  0x4a   : > { %p930_p12 = scmp.ne.s32.totalorder %s1193_s24, %s929_s29  ;;  %s934_s5 = scalar_lea.hbm %s1296_s0, 256 }
  0x4b   : > { %p935_p13 = scmp.lt.u32.totalorder %s1193_s24, %s1296_s0  ;;  %p936_p6 = scmp.lt.u32.totalorder %s934_s5, %s929_s29 }
  0x4c   : > { %p932_p2 = pnand %p931_p0, %p930_p12  ;;  %p938_p3 = scmp.lt.u32.totalorder %s929_s29, %s1193_s24 }
  0x4d   : > { %p937_p10 = por %p936_p6, %p935_p13 }
  0x4e   : > { %p933_p1 = pneg %p932_p2 }
  0x4f   : > { %p939_p5 = por %p938_p3, %p937_p10 }
  0x51   : > { %p940_p9 = pnand %p939_p5, %p933_p1 }
  0x53   : > { %943 = shalt.err (!%p940_p9)
}
  0x54   : > { %s944_s23 = scalar_lea.vmem %s1195_s27, 128  ;;  %s1037_s11 = smov [#allocation2]  }
  0x55   : > { %p945_p12 = scmp.ne.s32.totalorder %s1195_s27, %s944_s23  ;;  %s949_s25 = sshll.u32 %s1037_s11, 4  ;;  %s950_s25 = int_to_ptr.vmem [resolvable:$false] %s949_s25 }
  0x56   : > { %s951_s17 = scalar_lea.vmem %s950_s25, 256  ;;  %p952_p4 = scmp.lt.s32.totalorder %s1195_s27, %s950_s25 }
  0x57   : > { %p947_p2 = pnand %p945_p12, %p931_p0  ;;  %p953_p13 = scmp.lt.s32.totalorder %s951_s17, %s944_s23 }
  0x59   : > { %p948_p7 = pneg %p947_p2  ;;  %p954_p6 = por %p953_p13, %p952_p4 }
  0x5b   : > { %p955_p10 = pnand %p954_p6, %p948_p7 }
  0x5d   : > { %958 = shalt.err (!%p955_p10)
}
  0x5e   : > { %815 = dma.hbm_to_vmem [thread:$0]  (!%p1197_p11), %s1193_s24, 128, %s1195_s27, %s159_s22  }
  0x5f   : > { %178 = sbr.rel (%p1100_p8) target bundleno = 615 (0x267), region = 32  ;;  %s1229_s21 = sand.u32 (!%p1100_p8), 1, %s1021_s13  }
  0x60   : > { %s652_s26 = sshll.u32 (!%p1100_p8), %s1229_s21, 3  ;;  %s181_s29 = scalar_lea.sflag (!%p1100_p8), [#allocation3], %s1229_s21 }
  0x61   : > { %s1235_s30 = scalar_lea.vmem (!%p1100_p8), [#allocation2], %s652_s26  ;;  %p1310_p4 = scmp.ne.s32.totalorder (!%p1100_p8), %s1303_s18, 0 }
  0x66   : > { %1004 = dma.done.wait (%p1310_p4), %s181_s29, 128  }
  0x67   : > { %1006 = vsyncadd (%p1310_p4), %s181_s29, 4294967168  ;;  %p1311_p7 = scmp.eq.s32.totalorder %s1081_s16, 0 }
  0x69   : > { %1008 = dma.done.wait (%p1311_p7), [#allocation6], 12288   ;;  %p1312_p8 = pmov %p1311_p7 }
  0x6a   : > { %v1038_v0 = vmov 0.0   ;;  %v217_v1 = vld [vmem:[#allocation5 + $0x8] sm:$0xff]  ;;  %v216_v3 = vld [vmem:[#allocation5] sm:$0xff]  ;;  %v219_v24 = vld [vmem:[#allocation5 + $0x18] sm:$0xff]  ;;  %s659_s18 = sshll.u32 %s1081_s16, 7  ;;  %s214_s20 = scalar_lea.vmem [#allocation8], %s652_s26 }
  0x6b   : > { %1010 = vsyncadd (%p1312_p8), [#allocation6], 4294955008  ;;  %344 = vmatprep.mubr.f32.mxu0 %v1038_v0  ;;  %415 = vmatprep.mubr.f32.mxu1 %v1038_v0  ;;  %v221_v2 = vld [vmem:[#allocation5 + $0x28] sm:$0xff]  ;;  %v220_v5 = vld [vmem:[#allocation5 + $0x20] sm:$0xff]  ;;  %s555_s24 = sshll.u32 %s214_s20, 4  ;;  %s1252_s22 = scalar_lea.hbm %s1299_s3, %s659_s18  ;;  %s1254_s24 = int_to_ptr.vmem [resolvable:$true] %s555_s24 }
  0x6c   : > { %v697_v4 = vpack.c.bf16 %v221_v2, %v217_v1  ;;  %v225_v6 = vld [vmem:[#allocation5 + $0x48] sm:$0xff]  ;;  %v699_v8 = vpack.c.bf16 %v220_v5, %v216_v3  ;;  %v224_v10 = vld [vmem:[#allocation5 + $0x40] sm:$0xff]  ;;  %v223_v25 = vld [vmem:[#allocation5 + $0x38] sm:$0xff]  ;;  %s542_s4 = scalar_lea.sflag [#allocation4], %s1229_s21  ;;  %s959_s5 = scalar_lea.vmem %s1254_s24, 128 }
  0x6d   : > { %v229_v7 = vld [vmem:[#allocation5 + $0x68] sm:$0xff]  ;;  %v228_v11 = vld [vmem:[#allocation5 + $0x60] sm:$0xff]  ;;  %v729_v28 = vpack.c.bf16 %v223_v25, %v219_v24  ;;  %v218_v29 = vld [vmem:[#allocation5 + $0x10] sm:$0xff]  ;;  %p960_p11 = scmp.ne.s32.totalorder %s1254_s24, %s959_s5  ;;  %p1313_p0 = scmp.ne.s32.totalorder %s1308_s10, 0 }
  0x6e   : > { %v701_v9 = vpack.c.bf16 %v229_v7, %v225_v6  ;;  %v233_v12 = vld [vmem:[#allocation5 + $0x88] sm:$0xff]  ;;  %698 = vmatprep.subr.bf16.mxu0 %v697_v4  ;;  %v703_v14 = vpack.c.bf16 %v228_v11, %v224_v10  ;;  %v232_v16 = vld [vmem:[#allocation5 + $0x80] sm:$0xff]  ;;  %v222_v31 = vld [vmem:[#allocation5 + $0x30] sm:$0xff]  ;;  %s1039_s16 = smov [#allocation8]  }
  0x6f   : > { %v237_v13 = vld [vmem:[#allocation5 + $0xa8] sm:$0xff]  ;;  %700 = vmatpush1.bf16.msra.mxu0 %v699_v8  ;;  %v236_v17 = vld [vmem:[#allocation5 + $0xa0] sm:$0xff]  ;;  %730 = vmatprep.subr.bf16.mxu1 %v729_v28  ;;  %v731_v34 = vpack.c.bf16 %v222_v31, %v218_v29  ;;  %v227_v35 = vld [vmem:[#allocation5 + $0x58] sm:$0xff]  ;;  %p961_p1 = pnand %p960_p11, %p1313_p0  ;;  %s963_s7 = sshll.u32 %s1039_s16, 4  ;;  %s964_s7 = int_to_ptr.vmem [resolvable:$false] %s963_s7 }
  0x70   : > { %702 = vmatprep.subr.bf16.mxu0 %v701_v9  ;;  %v705_v15 = vpack.c.bf16 %v237_v13, %v233_v12  ;;  %v241_v18 = vld [vmem:[#allocation5 + $0xc8] sm:$0xff]  ;;  %v707_v20 = vpack.c.bf16 %v236_v17, %v232_v16  ;;  %v240_v21 = vld [vmem:[#allocation5 + $0xc0] sm:$0xff]  ;;  %v231_v36 = vld [vmem:[#allocation5 + $0x78] sm:$0xff]  ;;  %s965_s8 = scalar_lea.vmem %s964_s7, 256  ;;  %p966_p5 = scmp.lt.s32.totalorder %s1254_s24, %s964_s7 }
  0x71   : > { %v245_v19 = vld [vmem:[#allocation5 + $0xe8] sm:$0xff]  ;;  %v244_v23 = vld [vmem:[#allocation5 + $0xe0] sm:$0xff]  ;;  %v733_v38 = vpack.c.bf16 %v231_v36, %v227_v35  ;;  %v226_v39 = vld [vmem:[#allocation5 + $0x50] sm:$0xff]  ;;  %732 = vmatpush1.bf16.msra.mxu1 %v731_v34  ;;  %p962_p3 = pneg %p961_p1  ;;  %p967_p9 = scmp.lt.s32.totalorder %s965_s8, %s959_s5 }
  0x72   : > { %v709_v22 = vpack.c.bf16 %v245_v19, %v241_v18  ;;  %v249_v26 = vld [vmem:[#allocation5 + $0x108] sm:$0xff]  ;;  %v248_v30 = vld [vmem:[#allocation5 + $0x100] sm:$0xff]  ;;  %v711_v32 = vpack.c.bf16 %v244_v23, %v240_v21  ;;  %v230_v40 = vld [vmem:[#allocation5 + $0x70] sm:$0xff] }
  0x73   : > { %704 = vmatpush1.bf16.msra.mxu0 %v703_v14  ;;  %v253_v27 = vld [vmem:[#allocation5 + $0x128] sm:$0xff]  ;;  %v252_v33 = vld [vmem:[#allocation5 + $0x120] sm:$0xff]  ;;  %v235_v41 = vld [vmem:[#allocation5 + $0x98] sm:$0xff]  ;;  %v735_v44 = vpack.c.bf16 %v230_v40, %v226_v39  ;;  %734 = vmatprep.subr.bf16.mxu1 %v733_v38  ;;  %p968_p12 = por %p967_p9, %p966_p5 }
  0x74   : > { %706 = vmatprep.subr.bf16.mxu0 %v705_v15  ;;  %v713_v37 = vpack.c.bf16 %v253_v27, %v249_v26  ;;  %v257_v42 = vld [vmem:[#allocation5 + $0x148] sm:$0xff]  ;;  %v239_v45 = vld [vmem:[#allocation5 + $0xb8] sm:$0xff]  ;;  %v234_v47 = vld [vmem:[#allocation5 + $0x90] sm:$0xff]  ;;  %v715_v49 = vpack.c.bf16 %v252_v33, %v248_v30 }
  0x75   : > { %v261_v43 = vld [vmem:[#allocation5 + $0x168] sm:$0xff]  ;;  %v737_v46 = vpack.c.bf16 %v239_v45, %v235_v41  ;;  %v238_v48 = vld [vmem:[#allocation5 + $0xb0] sm:$0xff]  ;;  %v243_v50 = vld [vmem:[#allocation5 + $0xd8] sm:$0xff]  ;;  %736 = vmatpush1.bf16.msra.mxu1 %v735_v44  ;;  %p969_p2 = pnand %p968_p12, %p962_p3 }
  0x76   : > { %v247_v51 = vld [vmem:[#allocation5 + $0xf8] sm:$0xff]  ;;  %v717_v52 = vpack.c.bf16 %v261_v43, %v257_v42  ;;  %v256_v53 = vld [vmem:[#allocation5 + $0x140] sm:$0xff]  ;;  %v265_v55 = vld [vmem:[#allocation5 + $0x188] sm:$0xff]  ;;  %v739_v57 = vpack.c.bf16 %v238_v48, %v234_v47 }
  0x77   : > { %708 = vmatpush1.bf16.msra.mxu0 %v707_v20  ;;  %v260_v54 = vld [vmem:[#allocation5 + $0x160] sm:$0xff]  ;;  %v269_v56 = vld [vmem:[#allocation5 + $0x1a8] sm:$0xff]  ;;  %738 = vmatprep.subr.bf16.mxu1 %v737_v46  ;;  %v741_v58 = vpack.c.bf16 %v247_v51, %v243_v50  ;;  %v242_v59 = vld [vmem:[#allocation5 + $0xd0] sm:$0xff] }
  0x78   : > { %710 = vmatprep.subr.bf16.mxu0 %v709_v22  ;;  %v246_v60 = vld [vmem:[#allocation5 + $0xf0] sm:$0xff]  ;;  %v719_v61 = vpack.c.bf16 %v260_v54, %v256_v53  ;;  %v251_v62 = vld [vmem:[#allocation5 + $0x118] sm:$0xff]  ;;  %v721_v0 = vpack.c.bf16 %v269_v56, %v265_v55  ;;  %v264_v1 = vld [vmem:[#allocation5 + $0x180] sm:$0xff] }
  0x79   : > { %v255_v63 = vld [vmem:[#allocation5 + $0x138] sm:$0xff]  ;;  %v268_v2 = vld [vmem:[#allocation5 + $0x1a0] sm:$0xff]  ;;  %v273_v3 = vld [vmem:[#allocation5 + $0x1c8] sm:$0xff]  ;;  %740 = vmatpush1.bf16.msra.mxu1 %v739_v57  ;;  %v743_v5 = vpack.c.bf16 %v246_v60, %v242_v59 }
  0x7a   : > { %v277_v4 = vld [vmem:[#allocation5 + $0x1e8] sm:$0xff]  ;;  %742 = vmatprep.subr.bf16.mxu1 %v741_v58  ;;  %v745_v6 = vpack.c.bf16 %v255_v63, %v251_v62  ;;  %v250_v7 = vld [vmem:[#allocation5 + $0x110] sm:$0xff]  ;;  %v723_v9 = vpack.c.bf16 %v268_v2, %v264_v1  ;;  %v259_v10 = vld [vmem:[#allocation5 + $0x158] sm:$0xff] }
  0x7b   : > { %712 = vmatpush1.bf16.msra.mxu0 %v711_v32  ;;  %v254_v8 = vld [vmem:[#allocation5 + $0x130] sm:$0xff]  ;;  %v263_v11 = vld [vmem:[#allocation5 + $0x178] sm:$0xff]  ;;  %v725_v12 = vpack.c.bf16 %v277_v4, %v273_v3  ;;  %v272_v13 = vld [vmem:[#allocation5 + $0x1c0] sm:$0xff] }
  0x7c   : > { %714 = vmatprep.subr.bf16.mxu0 %v713_v37  ;;  %v276_v14 = vld [vmem:[#allocation5 + $0x1e0] sm:$0xff]  ;;  %v747_v15 = vpack.c.bf16 %v254_v8, %v250_v7  ;;  %v749_v16 = vpack.c.bf16 %v263_v11, %v259_v10  ;;  %v258_v17 = vld [vmem:[#allocation5 + $0x150] sm:$0xff]  ;;  %v267_v20 = vld [vmem:[#allocation5 + $0x198] sm:$0xff] }
  0x7d   : > { %744 = vmatpush1.bf16.msra.mxu1 %v743_v5  ;;  %v262_v18 = vld [vmem:[#allocation5 + $0x170] sm:$0xff]  ;;  %v727_v19 = vpack.c.bf16 %v276_v14, %v272_v13  ;;  %v271_v21 = vld [vmem:[#allocation5 + $0x1b8] sm:$0xff]  ;;  %v454_v34 = vld [vmem:[#allocation7 + $0x80] sm:$0xff] }
  0x7e   : > { %746 = vmatprep.subr.bf16.mxu1 %v745_v6  ;;  %v751_v22 = vpack.c.bf16 %v262_v18, %v258_v17  ;;  %v753_v23 = vpack.c.bf16 %v271_v21, %v267_v20  ;;  %v266_v24 = vld [vmem:[#allocation5 + $0x190] sm:$0xff]  ;;  %v275_v27 = vld [vmem:[#allocation5 + $0x1d8] sm:$0xff]  ;;  %v455_v35 = vld [vmem:[#allocation7 + $0x88] sm:$0xff] }
  0x7f   : > { %716 = vmatpush1.bf16.msra.mxu0 %v715_v49  ;;  %v270_v25 = vld [vmem:[#allocation5 + $0x1b0] sm:$0xff]  ;;  %v279_v28 = vld [vmem:[#allocation5 + $0x1f8] sm:$0xff]  ;;  %v761_v36 = vpack.c.bf16 %v455_v35, %v454_v34  ;;  %v438_v37 = vld [vmem:[#allocation7] sm:$0xff] }
  0x80   : > { %718 = vmatprep.subr.bf16.mxu0 %v717_v52  ;;  %v215_v26 = vld [vmem:[%s1235_s30] sm:$0xff]  ;;  %v755_v29 = vpack.c.bf16 %v270_v25, %v266_v24  ;;  %v757_v30 = vpack.c.bf16 %v279_v28, %v275_v27  ;;  %v439_v38 = vld [vmem:[#allocation7 + $0x8] sm:$0xff]  ;;  %v458_v46 = vld [vmem:[#allocation7 + $0xa0] sm:$0xff] }
  0x81   : > { %748 = vmatpush1.bf16.msra.mxu1 %v747_v15  ;;  %v274_v31 = vld [vmem:[#allocation5 + $0x1d0] sm:$0xff]  ;;  %v763_v39 = vpack.c.bf16 %v439_v38, %v438_v37  ;;  %v457_v41 = vld [vmem:[#allocation7 + $0x98] sm:$0xff]  ;;  %v459_v47 = vld [vmem:[#allocation7 + $0xa8] sm:$0xff] }
  0x82   : > { %750 = vmatprep.subr.bf16.mxu1 %v749_v16  ;;  %v278_v32 = vld [vmem:[#allocation5 + $0x1f0] sm:$0xff]  ;;  %v441_v44 = vld [vmem:[#allocation7 + $0x18] sm:$0xff]  ;;  %v769_v48 = vpack.c.bf16 %v459_v47, %v458_v46  ;;  %v442_v49 = vld [vmem:[#allocation7 + $0x20] sm:$0xff] }
  0x83   : > { %720 = vmatpush1.bf16.msra.mxu0 %v719_v61  ;;  %v759_v33 = vpack.c.bf16 %v278_v32, %v274_v31  ;;  %v456_v40 = vld [vmem:[#allocation7 + $0x90] sm:$0xff]  ;;  %v443_v50 = vld [vmem:[#allocation7 + $0x28] sm:$0xff]  ;;  %v461_v53 = vld [vmem:[#allocation7 + $0xb8] sm:$0xff] }
  0x84   : > { %722 = vmatprep.subr.bf16.mxu0 %v721_v0  ;;  %v765_v42 = vpack.c.bf16 %v457_v41, %v456_v40  ;;  %v440_v43 = vld [vmem:[#allocation7 + $0x10] sm:$0xff]  ;;  %v771_v51 = vpack.c.bf16 %v443_v50, %v442_v49  ;;  %v445_v56 = vld [vmem:[#allocation7 + $0x38] sm:$0xff]  ;;  %v462_v58 = vld [vmem:[#allocation7 + $0xc0] sm:$0xff] }
  0x85   : > { %752 = vmatpush1.bf16.msra.mxu1 %v751_v22  ;;  %v767_v45 = vpack.c.bf16 %v441_v44, %v440_v43  ;;  %v460_v52 = vld [vmem:[#allocation7 + $0xb0] sm:$0xff]  ;;  %v463_v59 = vld [vmem:[#allocation7 + $0xc8] sm:$0xff]  ;;  %v446_v61 = vld [vmem:[#allocation7 + $0x40] sm:$0xff] }
  0x86   : > { %754 = vmatprep.subr.bf16.mxu1 %v753_v23  ;;  %v773_v54 = vpack.c.bf16 %v461_v53, %v460_v52  ;;  %v444_v55 = vld [vmem:[#allocation7 + $0x30] sm:$0xff]  ;;  %v777_v60 = vpack.c.bf16 %v463_v59, %v462_v58  ;;  %v447_v62 = vld [vmem:[#allocation7 + $0x48] sm:$0xff]  ;;  %v465_v1 = vld [vmem:[#allocation7 + $0xd8] sm:$0xff] }
  0x87   : > { %724 = vmatpush1.bf16.msra.mxu0 %v723_v9  ;;  %v775_v57 = vpack.c.bf16 %v445_v56, %v444_v55  ;;  %v779_v63 = vpack.c.bf16 %v447_v62, %v446_v61  ;;  %v464_v0 = vld [vmem:[#allocation7 + $0xd0] sm:$0xff]  ;;  %v449_v4 = vld [vmem:[#allocation7 + $0x58] sm:$0xff]  ;;  %v466_v6 = vld [vmem:[#allocation7 + $0xe0] sm:$0xff] }
  0x88   : > { %726 = vmatprep.subr.bf16.mxu0 %v725_v12  ;;  %v781_v2 = vpack.c.bf16 %v465_v1, %v464_v0  ;;  %v448_v3 = vld [vmem:[#allocation7 + $0x50] sm:$0xff]  ;;  %v467_v7 = vld [vmem:[#allocation7 + $0xe8] sm:$0xff]  ;;  %v450_v9 = vld [vmem:[#allocation7 + $0x60] sm:$0xff] }
  0x89   : > { %756 = vmatpush1.bf16.msra.mxu1 %v755_v29  ;;  %v783_v5 = vpack.c.bf16 %v449_v4, %v448_v3  ;;  %v785_v8 = vpack.c.bf16 %v467_v7, %v466_v6  ;;  %v451_v10 = vld [vmem:[#allocation7 + $0x68] sm:$0xff]  ;;  %v468_v12 = vld [vmem:[#allocation7 + $0xf0] sm:$0xff]  ;;  %v469_v13 = vld [vmem:[#allocation7 + $0xf8] sm:$0xff] }
  0x8a   : > { %758 = vmatprep.subr.bf16.mxu1 %v757_v30  ;;  %v787_v11 = vpack.c.bf16 %v451_v10, %v450_v9  ;;  %v789_v14 = vpack.c.bf16 %v469_v13, %v468_v12  ;;  %v452_v15 = vld [vmem:[#allocation7 + $0x70] sm:$0xff]  ;;  %v453_v16 = vld [vmem:[#allocation7 + $0x78] sm:$0xff] }
  0x8b   : > { %728 = vmatpush1.bf16.msra.mxu0 %v727_v19  ;;  %v791_v17 = vpack.c.bf16 %v453_v16, %v452_v15 }
  0x8c   : > { %762 = vmatprep.subr.bf16.mxu0 %v761_v36 }
  0x8d   : > { %760 = vmatpush1.bf16.msra.mxu1 %v759_v33 }
  0x8e   : > { %345 = vmatmul.mubr.f32.vlgmr.msra.gmra.mrb[0].mxu0 %v215_v26 }
  0x8f   : > { %764 = vmatpush3.bf16.msra.mxu0 %v763_v39 }
  0x90   : > { %416 = vmatmul.mubr.f32.vlgmr.msra.gmra.mrb[0].mxu1 %v215_v26  ;;  %766 = vmatprep.subr.bf16.mxu0 %v765_v42 }
  0x93   : > { %768 = vmatpush3.bf16.msra.mxu0 %v767_v45 }
  0x94   : > { %770 = vmatprep.subr.bf16.mxu0 %v769_v48 }
  0x97   : > { %772 = vmatpush3.bf16.msra.mxu0 %v771_v51 }
  0x98   : > { %774 = vmatprep.subr.bf16.mxu0 %v773_v54 }
  0x9b   : > { %776 = vmatpush3.bf16.msra.mxu0 %v775_v57 }
  0x9c   : > { %778 = vmatprep.subr.bf16.mxu0 %v777_v60 }
  0x9f   : > { %780 = vmatpush3.bf16.msra.mxu0 %v779_v63 }
  0xa0   : > { %782 = vmatprep.subr.bf16.mxu0 %v781_v2 }
  0xa3   : > { %784 = vmatpush3.bf16.msra.mxu0 %v783_v5 }
  0xa4   : > { %786 = vmatprep.subr.bf16.mxu0 %v785_v8 }
  0xa7   : > { %788 = vmatpush3.bf16.msra.mxu0 %v787_v11 }
  0xa8   : > { %790 = vmatprep.subr.bf16.mxu0 %v789_v14 }
  0xab   : > { %792 = vmatpush3.bf16.msra.mxu0 %v791_v17 }
 0x161   : > { %v346_v18 = vpop.f32.mrb[0].mxu0 }
 0x162   : > { %v656_v19 = vmul.f32 -1.442695, %v346_v18  ;;  %v348_v20 = vpop.f32.mrb[1].mxu0 }
 0x163   : > { %v657_v21 = vmul.f32 -1.442695, %v348_v20  ;;  %v417_v22 = vpop.f32.mrb[0].mxu1 }
 0x164   : > { %865 = vpow2.f32 %v656_v19  ;;  %v419_v23 = vpop.f32.mrb[1].mxu1 }
 0x165   : > { %867 = vpow2.f32 %v657_v21 }
 0x16e   : > { %v866_v24 = vpop.eup %865 }
 0x16f   : > { %v868_v25 = vpop.eup %867  ;;  %v428_v26 = vadd.f32 1.0, %v866_v24 }
 0x170   : > { %v429_v27 = vadd.f32 1.0, %v868_v25 }
 0x171   : > { %869 = vrcp.f32 %v428_v26 }
 0x172   : > { %871 = vrcp.f32 %v429_v27 }
 0x17b   : > { %v870_v28 = vpop.eup %869 }
 0x17c   : > { %v872_v29 = vpop.eup %871  ;;  %v434_v30 = vmul.f32 %v870_v28, %v346_v18 }
 0x17d   : > { %v435_v31 = vmul.f32 %v872_v29, %v348_v20 }
 0x17e   : > { %v436_v32 = vmul.f32 %v434_v30, %v417_v22 }
 0x17f   : > { %v437_v33 = vmul.f32 %v435_v31, %v419_v23 }
 0x181   : > { %534 = vmatprep.mubr.f32.mxu0 %v437_v33 }
 0x182   : > { %535 = vmatmul.mubr.f32.vlgmr.msra.gmra.mrb[2].mxu0 %v436_v32 }
 0x255   : > { %v694_v34 = vpop.f32.mrb[2].mxu0 }
 0x256   : > { %v695_v35 = vpop.f32.mrb[3].mxu0 }
 0x257   : > { %v696_v36 = vadd.f32 %v695_v35, %v694_v34 }
 0x259   : > { %540 = vst [vmem:[%s214_s20] sm:$0xff] %v696_v36 }
 0x25a   : > { %972 = shalt.err (!%p969_p2)
}
 0x25b   : > { %s973_s23 = scalar_lea.hbm %s1252_s22, 128  ;;  %s977_s17 = scalar_lea.hbm %s1299_s3, 256 }
 0x25c   : > { %p974_p13 = scmp.ne.s32.totalorder %s1252_s22, %s973_s23  ;;  %p978_p4 = scmp.lt.u32.totalorder %s1252_s22, %s1299_s3 }
 0x25d   : > { %p979_p7 = scmp.lt.u32.totalorder %s977_s17, %s973_s23  ;;  %p981_p11 = scmp.lt.u32.totalorder %s973_s23, %s1252_s22 }
 0x25e   : > { %p975_p6 = pnand %p974_p13, %p1313_p0 }
 0x25f   : > { %p980_p8 = por %p979_p7, %p978_p4 }
 0x260   : > { %p976_p10 = pneg %p975_p6 }
 0x261   : > { %p982_p1 = por %p981_p11, %p980_p8 }
 0x263   : > { %p983_p3 = pnand %p982_p1, %p976_p10 }
 0x265   : > { %986 = shalt.err (!%p983_p3)
}
 0x266   : > { %803 = dma.vmem_to_hbm [thread:$0]  (%p1313_p0), %s1254_s24, 128, %s1252_s22, %s542_s4  }
 0x267 PF: > { %s567_s29 = sand.u32 1, %s1017_s12   ;;  %p1314_p5 = scmp.ne.s32.totalorder %s1304_s19, 0 }
 0x268   : > { %p1315_p9 = scmp.ge.s32.totalorder %s1029_s15, 2  ;;  %s568_s30 = scalar_lea.sflag [#allocation4], %s567_s29 }
 0x26a   : > { %p817_p12 = pnand %p1315_p9, %p1314_p5 }
 0x26c   : > { %1012 = dma.done.wait (!%p817_p12), %s568_s30, 128  }
 0x26d   : > { %1014 = vsyncadd (!%p817_p12), %s568_s30, 4294967168  ;;  %p17_p2 = scmp.ge.s32.totalorder %s1170_s6, 4   ;;  %s1316_s12 = smov %s1021_s13 }
 0x26e   : > { %s1317_s13 = smov %s1025_s14  ;;  %s1318_s14 = smov %s1179_s9 }
 0x26f   : > { %s1319_s15 = smov %s1170_s6  ;;  %19 = sbr.rel (!%p17_p2) target bundleno = 6 (0x6), region = 85 }
 0x276   :  { %573 = vsyncpa [#allocation3], 1 }
 0x277   :  { %575 = vsyncpa [#allocation3 + $0x1], 1 }
 0x278   :  { %576 = vsyncpa [#allocation6], 1 }
 0x279   :  { %577 = vsyncpa [#allocation4], 1 }
 0x27a   :  { %579 = vsyncpa [#allocation4 + $0x1], 1 }

</bundles_post_ra>
